<compile_context>
chip_gen: v7x
topology: tpu7x:2x2x1
jax: 0.10.0
libtpu: 0.0.40
codegen_flags: <defaults>
</compile_context>

<pallas_src>
import numpy as np
import jax
import jax.numpy as jnp
from jax.experimental import pallas as pl
from jax.experimental.pallas import tpu as pltpu


# ----------------------------------------------------------------------------
# Pallas kernel: fused conv1 (+bias) -> residual add -> ReLU -> conv2
# ----------------------------------------------------------------------------
def gcn_kernel(x_ref, w1t_ref, b1_ref, w2_ref, o_ref):
    """One batch element.

    x_ref  : (1, Sp, Mp)  activations, states on sublanes / nodes on lanes
    w1t_ref: (Mp, Mp)     conv1 weight, already transposed (in_node, out_node)
    b1_ref : (1, Mp)      conv1 bias
    w2_ref : (Sp, Sp)     conv2 weight (out_state, in_state)
    o_ref  : (1, Sp, Mp)  output
    """
    x = x_ref[0]                                                     # (Sp, Mp)
    # conv1: mixes the node axis -> X @ W1^T + b1  (single MXU matmul)
    h = jnp.dot(x, w1t_ref[...], preferred_element_type=jnp.float32) + b1_ref[...]
    # residual + ReLU (VPU, stays in vregs)
    h = jnp.maximum(h + x, 0.0)
    # conv2: mixes the state axis -> W2 @ relu(h)  (single MXU matmul)
    o_ref[0] = jnp.dot(w2_ref[...], h, preferred_element_type=jnp.float32)


# ----------------------------------------------------------------------------
# Wrapper
# ----------------------------------------------------------------------------
def _round_up(v, m):
    return (v + m - 1) // m * m


def gcn_forward(x, w1, b1, w2):
    """GCN forward.

    x : (B, num_state, num_node) float32
    w1: (num_node, num_node)  conv1 weight (out_node, in_node), kernel_size=1
    b1: (num_node,)           conv1 bias
    w2: (num_state, num_state) conv2 weight (out_state, in_state), no bias
    returns (B, num_state, num_node) float32
    """
    B, S, M = x.shape
    Sp = _round_up(S, 8)       # sublane multiple
    Mp = _round_up(M, 128)     # lane multiple  -> lane-dense stores

    # Zero-padding is exact: padded node columns stay zero through both convs
    # (W1^T / b1 / W2 are zero-padded), padded state rows are killed by the
    # zero-padded columns of W2 before they can reach a real output row.
    xp  = jnp.pad(x, ((0, 0), (0, Sp - S), (0, Mp - M)))
    w1t = jnp.pad(w1.T, ((0, Mp - M), (0, Mp - M)))                  # (Mp, Mp)
    b1p = jnp.pad(b1, (0, Mp - M)).reshape(1, Mp)
    w2p = jnp.pad(w2, ((0, Sp - S), (0, Sp - S)))                    # (Sp, Sp)

    out = pl.pallas_call(
        gcn_kernel,
        out_shape=jax.ShapeDtypeStruct((B, Sp, Mp), jnp.float32),
        grid=(B,),
        in_specs=[
            pl.BlockSpec((1, Sp, Mp), lambda b: (b, 0, 0)),
            pl.BlockSpec((Mp, Mp), lambda b: (0, 0)),     # weights: same block
            pl.BlockSpec((1, Mp), lambda b: (0, 0)),      # every step (resident)
            pl.BlockSpec((Sp, Sp), lambda b: (0, 0)),
        ],
        out_specs=pl.BlockSpec((1, Sp, Mp), lambda b: (b, 0, 0)),
        compiler_params=pltpu.CompilerParams(
            dimension_semantics=("parallel",),            # v7x: 2 TCs share the batch
        ),
    )(xp, w1t, b1p, w2p)

    return out[:, :S, :M]
    # TODO(synk): for very large num_node/num_state, additionally tile the
    #             output-node axis on the grid (each tile still reads full X).


# ----------------------------------------------------------------------------
# Pure-JAX reference for verification
# ----------------------------------------------------------------------------
def ref_forward(x, w1, b1, w2):
    h = jnp.einsum("nm,bsm->bsn", w1, x) + b1     # conv1 over nodes (+bias)
    h = jnp.maximum(h + x, 0.0)                   # residual + ReLU
    return jnp.einsum("st,btn->bsn", w2, h)       # conv2 over states


# ----------------------------------------------------------------------------
if __name__ == "__main__":
    key = jax.random.PRNGKey(0)

    def run_case(k, B, num_state, num_node):
        kx, k1, kb, k2 = jax.random.split(k, 4)
        x = jax.random.normal(kx, (B, num_state, num_node), dtype=jnp.float32)
        w1 = jax.random.normal(k1, (num_node, num_node), dtype=jnp.float32) / np.sqrt(num_node)
        b1 = jax.random.normal(kb, (num_node,), dtype=jnp.float32) * 0.1
        w2 = jax.random.normal(k2, (num_state, num_state), dtype=jnp.float32) / np.sqrt(num_state)

        out = jax.block_until_ready(gcn_forward(x, w1, b1, w2))
        ref = jax.block_until_ready(ref_forward(x, w1, b1, w2))
        np.testing.assert_allclose(np.asarray(out), np.asarray(ref),
                                   rtol=2e-3, atol=2e-3)

    ka, kb = jax.random.split(key)
    run_case(ka, B=2, num_state=64, num_node=128)   # lane-aligned (no padding)
    run_case(kb, B=2, num_state=50, num_node=70)    # exercises the pad/slice path

    print("KERNEL_OK")
</pallas_src>

<mosaic_0001>
module attributes {stable_mosaic.version = 11 : i64} {
  func.func @gcn_kernel(%arg0: i32, %arg1: memref<1x64x128xf32, #tpu.memory_space<vmem>>, %arg2: memref<128x128xf32, #tpu.memory_space<vmem>>, %arg3: memref<1x128xf32, #tpu.memory_space<vmem>>, %arg4: memref<64x64xf32, #tpu.memory_space<vmem>>, %arg5: memref<1x64x128xf32, #tpu.memory_space<vmem>>) attributes {dimension_semantics = [#tpu.dimension_semantics<parallel>], iteration_bounds = array<i64: 2>, scalar_prefetch = 0 : i64, scratch_operands = 0 : i64, tpu.core_type = #tpu.core_type<tc>, window_params = [{transform_indices = @transform_0, window_bounds = array<i64: 1, 64, 128>}, {pipeline_mode = #tpu.pipeline_mode<synchronous>, transform_indices = @transform_1, window_bounds = array<i64: 128, 128>}, {pipeline_mode = #tpu.pipeline_mode<synchronous>, transform_indices = @transform_2, window_bounds = array<i64: 1, 128>}, {pipeline_mode = #tpu.pipeline_mode<synchronous>, transform_indices = @transform_3, window_bounds = array<i64: 64, 64>}, {transform_indices = @transform_4, window_bounds = array<i64: 1, 64, 128>}]} {
    %c0 = arith.constant 0 : index
    %c0_0 = arith.constant 0 : index
    %c0_1 = arith.constant 0 : index
    %0 = vector.load %arg1[%c0, %c0_0, %c0_1] : memref<1x64x128xf32, #tpu.memory_space<vmem>>, vector<1x64x128xf32>
    %1 = vector.shape_cast %0 : vector<1x64x128xf32> to vector<64x128xf32>
    %c0_2 = arith.constant 0 : index
    %c0_3 = arith.constant 0 : index
    %2 = vector.load %arg2[%c0_2, %c0_3] : memref<128x128xf32, #tpu.memory_space<vmem>>, vector<128x128xf32>
    %cst = arith.constant dense<0.000000e+00> : vector<64x128xf32>
    %3 = tpu.matmul %1, %2, %cst {dimension_numbers = #tpu.dot_dimension_numbers<[1], [0], [0], [1], [0, 0, 1, 1], [], []>} : vector<64x128xf32>, vector<128x128xf32>, vector<64x128xf32> -> vector<64x128xf32>
    %c0_4 = arith.constant 0 : index
    %c0_5 = arith.constant 0 : index
    %4 = vector.load %arg3[%c0_4, %c0_5] : memref<1x128xf32, #tpu.memory_space<vmem>>, vector<1x128xf32>
    %5 = vector.broadcast %4 : vector<1x128xf32> to vector<64x128xf32>
    %6 = arith.addf %3, %5 : vector<64x128xf32>
    %7 = arith.addf %6, %1 : vector<64x128xf32>
    %cst_6 = arith.constant 0.000000e+00 : f32
    %8 = vector.broadcast %cst_6 : f32 to vector<64x128xf32>
    %9 = arith.maximumf %7, %8 : vector<64x128xf32>
    %c0_7 = arith.constant 0 : index
    %c0_8 = arith.constant 0 : index
    %10 = vector.load %arg4[%c0_7, %c0_8] : memref<64x64xf32, #tpu.memory_space<vmem>>, vector<64x64xf32>
    %cst_9 = arith.constant dense<0.000000e+00> : vector<64x128xf32>
    %11 = tpu.matmul %10, %9, %cst_9 {dimension_numbers = #tpu.dot_dimension_numbers<[1], [0], [0], [1], [0, 0, 1, 1], [], []>} : vector<64x64xf32>, vector<64x128xf32>, vector<64x128xf32> -> vector<64x128xf32>
    %c0_10 = arith.constant 0 : index
    %c0_11 = arith.constant 0 : index
    %c0_12 = arith.constant 0 : index
    %12 = vector.load %arg5[%c0_10, %c0_11, %c0_12] : memref<1x64x128xf32, #tpu.memory_space<vmem>>, vector<1x64x128xf32>
    %13 = vector.shape_cast %12 : vector<1x64x128xf32> to vector<64x128xf32>
    %14 = vector.shape_cast %11 : vector<64x128xf32> to vector<1x64x128xf32>
    tpu.vector_store %arg5[%c0_10, %c0_11, %c0_12], %14 {strides = array<i32>} : memref<1x64x128xf32, #tpu.memory_space<vmem>>, vector<1x64x128xf32>,
    return
  }
  func.func @transform_0(%arg0: i32) -> (i32, i32, i32) {
    %c0_i32 = arith.constant 0 : i32
    %c0_i32_0 = arith.constant 0 : i32
    %c0_i32_1 = arith.constant 0 : i32
    return %arg0, %c0_i32, %c0_i32_0 : i32, i32, i32
  }
  func.func @transform_1(%arg0: i32) -> (i32, i32) {
    %c0_i32 = arith.constant 0 : i32
    %c0_i32_0 = arith.constant 0 : i32
    %c0_i32_1 = arith.constant 0 : i32
    return %c0_i32, %c0_i32_0 : i32, i32
  }
  func.func @transform_2(%arg0: i32) -> (i32, i32) {
    %c0_i32 = arith.constant 0 : i32
    %c0_i32_0 = arith.constant 0 : i32
    %c0_i32_1 = arith.constant 0 : i32
    return %c0_i32, %c0_i32_0 : i32, i32
  }
  func.func @transform_3(%arg0: i32) -> (i32, i32) {
    %c0_i32 = arith.constant 0 : i32
    %c0_i32_0 = arith.constant 0 : i32
    %c0_i32_1 = arith.constant 0 : i32
    return %c0_i32, %c0_i32_0 : i32, i32
  }
  func.func @transform_4(%arg0: i32) -> (i32, i32, i32) {
    %c0_i32 = arith.constant 0 : i32
    %c0_i32_0 = arith.constant 0 : i32
    %c0_i32_1 = arith.constant 0 : i32
    return %arg0, %c0_i32, %c0_i32_0 : i32, i32, i32
  }
}

</mosaic_0001>

<bundles_post_ra>
// kernel: tpu_custom_call.1
= control target key start
LH: loop header
LB: loop body
LE: loop exit
PB: predicated region body
PF: predicated region fallthrough
CT: control target
= control target key end

     0   :  { %9 = vsyncpa [#allocation3], 0  ;;  %s1368_s0 = inlined_call_operand.hbm [shape: f32[2,64,128], index: 0, kind: input, shape index: {}]   ;;  %s1369_s1 = inlined_call_operand.hbm [shape: f32[128,128], index: 1, kind: input, shape index: {}]   ;;  %s1370_s2 = inlined_call_operand.vmem [shape: f32[1,128], index: 2, kind: input, shape index: {}]   ;;  %s1371_s3 = inlined_call_operand.hbm [shape: f32[64,64], index: 3, kind: input, shape index: {}]   ;;  %s1372_s4 = inlined_call_operand.hbm [shape: f32[2,64,128], index: 4, kind: output, shape index: {}]  }
   0x1   :  { %11 = vsyncpa [#allocation3 + $0x1], 0 }
   0x2   :  { %12 = vsyncpa [#allocation6], 0 }
   0x3   :  { %13 = vsyncpa [#allocation4], 0 }
   0x4   :  { %15 = vsyncpa [#allocation4 + $0x1], 0  ;;  %s1100_s15 = smov 0   ;;  %s1102_s16 = smov 0  }
   0x5   :  { %s1104_s17 = smov 0   ;;  %s1106_s18 = smov 0  }
   0x6 LB: > { %s1121_s19 = sadd.s32 4294967295, %s1065_s18   ;;  %s649_s20 = sadd.s32 4294967294, %s1065_s18   ;;  %s1065_s18 = sphi %s1106_s18, %s1392_s18   ;;  %s1061_s17 = sphi %s1104_s17, %s1391_s17   ;;  %s1057_s16 = sphi %s1102_s16, %s1390_s16   ;;  %s1053_s15 = sphi %s1100_s15, %s1389_s15  }
   0x7   : > { %p41_p0 = scmp.ne.s32.totalorder %s1057_s16, %s1053_s15  ;;  %p1373_p1 = scmp.eq.s32.totalorder %s1121_s19, 0 }
   0x8   : > { %p134_p3 = scmp.eq.s32.totalorder %s649_s20, 1  ;;  %p650_p5 = scmp.ge.s32.totalorder %s1065_s18, 1 }
   0x9   : > { %p1130_p4 = por %p1373_p1, %p41_p0  ;;  %p141_p7 = scmp.lt.s32.totalorder %s1065_s18, 3 }
   0xa   : > { %p1135_p6 = por %p134_p3, %p41_p0  ;;  %s1067_s24 = smov [#allocation5]  }
   0xb   : > { %s1376_s21 = scalar_select %p1130_p4, 1, 0 }
   0xc   : > { %s1377_s22 = scalar_select %p1135_p6, 1, 0 }
   0xd   : > { %p1140_p8 = pnand %p650_p5, %p141_p7  ;;  %s153_s25 = sshll.u32 %s1067_s24, 4  ;;  %s1144_s25 = int_to_ptr.vmem [resolvable:$true] %s153_s25 }
   0xe   : > { %s1068_s27 = smov [#allocation7]   ;;  %s909_s5 = scalar_lea.hbm %s1369_s1, 2048 }
   0xf   : > { %p850_p9 = pneg %p1140_p8  ;;  %s169_s28 = sshll.u32 %s1068_s27, 4  ;;  %s1155_s28 = int_to_ptr.vmem [resolvable:$true] %s169_s28 }
  0x10   : > { %p910_p12 = scmp.ne.s32.totalorder %s1369_s1, %s909_s5  ;;  %p916_p5 = scmp.lt.u32.totalorder %s909_s5, %s1369_s1 }
  0x11   : > { %p1151_p11 = pnand %p850_p9, %p1373_p1 }
  0x13   : > { %p911_p13 = pneg %p1151_p11 }
  0x15   : > { %p912_p0 = pnand %p911_p13, %p910_p12 }
  0x17   : > { %p913_p3 = pneg %p912_p0 }
  0x19   : > { %p918_p7 = pnand %p916_p5, %p913_p3 }
  0x1b   : > { %921 = shalt.err (!%p918_p7)
}
  0x1c   : > { %s922_s10 = scalar_lea.vmem %s1144_s25, 2048  ;;  %p930_p2 = scmp.lt.s32.totalorder %s1144_s25, %s1144_s25 }
  0x1d   : > { %p923_p9 = scmp.ne.s32.totalorder %s1144_s25, %s922_s10  ;;  %p931_p12 = scmp.lt.s32.totalorder %s922_s10, %s922_s10 }
  0x1f   : > { %p925_p10 = pnand %p923_p9, %p911_p13  ;;  %p932_p0 = por %p931_p12, %p930_p2 }
  0x21   : > { %p926_p1 = pneg %p925_p10 }
  0x23   : > { %p933_p6 = pnand %p932_p0, %p926_p1 }
  0x25   : > { %936 = shalt.err (!%p933_p6)
}
  0x26   : > { %s1069_s11 = smov 128   ;;  %s1070_s12 = smov 8  }
  0x27   : > { %853 = dma.hbm_to_vmem [thread:$0]  (!%p1151_p11), %s1369_s1, 2048, %s1144_s25, [#allocation6], %s1069_s11, %s1069_s11, %s1070_s12  }
  0x28   : > { %s937_s27 = scalar_lea.hbm %s1371_s3, 1024 }
  0x29   : > { %p938_p1 = scmp.ne.s32.totalorder %s1371_s3, %s937_s27  ;;  %p944_p10 = scmp.lt.u32.totalorder %s937_s27, %s1371_s3 }
  0x2b   : > { %p940_p2 = pnand %p938_p1, %p911_p13 }
  0x2d   : > { %p941_p6 = pneg %p940_p2 }
  0x2f   : > { %p946_p3 = pnand %p944_p10, %p941_p6 }
  0x31   : > { %949 = shalt.err (!%p946_p3)
}
  0x32   : > { %s950_s25 = scalar_lea.vmem %s1155_s28, 1024  ;;  %p958_p12 = scmp.lt.s32.totalorder %s1155_s28, %s1155_s28 }
  0x33   : > { %p951_p5 = scmp.ne.s32.totalorder %s1155_s28, %s950_s25  ;;  %p959_p0 = scmp.lt.s32.totalorder %s950_s25, %s950_s25 }
  0x35   : > { %p953_p7 = pnand %p951_p5, %p911_p13  ;;  %p960_p1 = por %p959_p0, %p958_p12 }
  0x37   : > { %p954_p9 = pneg %p953_p7 }
  0x39   : > { %p961_p2 = pnand %p960_p1, %p954_p9 }
  0x3b   : > { %964 = shalt.err (!%p961_p2)
}
  0x3c   : > { %856 = dma.hbm_to_vmem [thread:$0]  (!%p1151_p11), %s1371_s3, 1024, %s1155_s28, [#allocation6], %s1069_s11, %s1069_s11, %s1070_s12  }
  0x3d   : > { %s1216_s26 = sadd.s32 1, %s1065_s18   ;;  %s28_s9 = sadd.s32 1, %s1061_s17 }
  0x3e   : > { %s25_s10 = ssub.s32 %s1065_s18, %s1216_s26  ;;  %p35_p13 = scmp.ne.s32.totalorder %s1061_s17, %s1057_s16 }
  0x3f   : > { %p26_p6 = scmp.eq.s32.totalorder %s25_s10, 0  ;;  %p36_p10 = scmp.eq.s32.totalorder %s1065_s18, 0 }
  0x40   : > { %p1380_p3 = scmp.eq.s32.totalorder %s1121_s19, 1  ;;  %p867_p7 = scmp.lt.s32.totalorder %s1065_s18, 2 }
  0x41   : > { %s1232_s14 = scalar_select %p26_p6, %s1061_s17, %s28_s9  }
  0x42   : > { %p1226_p5 = por %p1380_p3, %p35_p13  ;;  %p37_p9 = por %p36_p10, %p35_p13 }
  0x43   : > { %s183_s20 = sand.u32 1, %s1061_s17   ;;  %s676_s28 = sshll.u32 %s1065_s18, 10 }
  0x44   : > { %s1381_s13 = scalar_select %p1226_p5, 1, 0 }
  0x45   : > { %s654_s24 = sshll.u32 %s183_s20, 6  ;;  %s1239_s30 = scalar_lea.hbm %s1368_s0, %s676_s28 }
  0x46   : > { %s187_s5 = scalar_lea.vmem [#allocation2], %s654_s24  ;;  %p1243_p11 = pnand %p867_p7, %p37_p9 }
  0x47   : > { %s194_s6 = sshll.u32 %s187_s5, 4  ;;  %s1247_s7 = scalar_lea.sflag [#allocation3], %s183_s20  ;;  %s1241_s6 = int_to_ptr.vmem [resolvable:$true] %s194_s6 }
  0x48   : > { %s965_s8 = scalar_lea.hbm %s1239_s30, 1024  ;;  %p967_p0 = pneg %p1243_p11 }
  0x49   : > { %p966_p12 = scmp.ne.s32.totalorder %s1239_s30, %s965_s8  ;;  %s970_s24 = scalar_lea.hbm %s1368_s0, 2048 }
  0x4a   : > { %p971_p13 = scmp.lt.u32.totalorder %s1239_s30, %s1368_s0  ;;  %p972_p6 = scmp.lt.u32.totalorder %s970_s24, %s965_s8 }
  0x4b   : > { %p968_p1 = pnand %p967_p0, %p966_p12  ;;  %p974_p3 = scmp.lt.u32.totalorder %s965_s8, %s1239_s30 }
  0x4c   : > { %p973_p10 = por %p972_p6, %p971_p13 }
  0x4d   : > { %p969_p2 = pneg %p968_p1 }
  0x4e   : > { %p975_p7 = por %p974_p3, %p973_p10 }
  0x50   : > { %p976_p9 = pnand %p975_p7, %p969_p2 }
  0x52   : > { %979 = shalt.err (!%p976_p9)
}
  0x53   : > { %s980_s20 = scalar_lea.vmem %s1241_s6, 1024  ;;  %s1071_s29 = smov [#allocation2]  }
  0x54   : > { %p981_p12 = scmp.ne.s32.totalorder %s1241_s6, %s980_s20  ;;  %s985_s5 = sshll.u32 %s1071_s29, 4  ;;  %s986_s5 = int_to_ptr.vmem [resolvable:$false] %s985_s5 }
  0x55   : > { %s987_s9 = scalar_lea.vmem %s986_s5, 2048  ;;  %p988_p4 = scmp.lt.s32.totalorder %s1241_s6, %s986_s5 }
  0x56   : > { %p983_p1 = pnand %p981_p12, %p967_p0  ;;  %p989_p13 = scmp.lt.s32.totalorder %s987_s9, %s980_s20 }
  0x58   : > { %p984_p5 = pneg %p983_p1  ;;  %p990_p6 = por %p989_p13, %p988_p4 }
  0x5a   : > { %p991_p10 = pnand %p990_p6, %p984_p5 }
  0x5c   : > { %994 = shalt.err (!%p991_p10)
}
  0x5d   : > { %860 = dma.hbm_to_vmem [thread:$0]  (!%p1243_p11), %s1239_s30, 1024, %s1241_s6, %s1247_s7, %s1069_s11, %s1069_s11, %s1070_s12  }
  0x5e   : > { %206 = sbr.rel (%p1140_p8) target bundleno = 617 (0x269), region = 36  ;;  %s1281_s8 = sand.u32 (!%p1140_p8), 1, %s1057_s16  }
  0x5f   : > { %s658_s10 = sshll.u32 (!%p1140_p8), %s1281_s8, 6  ;;  %s209_s24 = scalar_lea.sflag (!%p1140_p8), [#allocation3], %s1281_s8 }
  0x60   : > { %s1287_s25 = scalar_lea.vmem (!%p1140_p8), [#allocation2], %s658_s10  ;;  %p1383_p4 = scmp.ne.s32.totalorder (!%p1140_p8), %s1376_s21, 0 }
  0x65   : > { %1040 = dma.done.wait (%p1383_p4), %s209_s24, 1024  }
  0x66   : > { %1042 = vsyncadd (%p1383_p4), %s209_s24, 4294966272  ;;  %p1384_p5 = scmp.eq.s32.totalorder %s1121_s19, 0 }
  0x68   : > { %1044 = dma.done.wait (%p1384_p5), [#allocation6], 3072   ;;  %p1385_p8 = pmov %p1384_p5 }
  0x69   : > { %v253_v0 = vld [vmem:[#allocation5] sm:$0xff]  ;;  %v254_v1 = vld [vmem:[#allocation5 + $0x8] sm:$0xff]  ;;  %v255_v2 = vld [vmem:[#allocation5 + $0x10] sm:$0xff]  ;;  %vm405_vm0 = vcmask 523264   ;;  %s244_s11 = scalar_lea.vmem [#allocation8], %s658_s10  ;;  %s677_s30 = sshll.u32 %s1121_s19, 10 }
  0x6a   : > { %1046 = vsyncadd (%p1385_p8), [#allocation6], 4294964224  ;;  %v790_v3 = vpack.c.bf16 %v254_v1, %v253_v0  ;;  %v256_v4 = vld [vmem:[#allocation5 + $0x18] sm:$0xff]  ;;  %v257_v6 = vld [vmem:[#allocation5 + $0x20] sm:$0xff]  ;;  %s557_s12 = sshll.u32 %s244_s11, 4  ;;  %s1324_s28 = scalar_lea.hbm %s1372_s4, %s677_s30  ;;  %s1319_s12 = int_to_ptr.vmem [resolvable:$true] %s557_s12 }
  0x6b   : > { %v794_v5 = vpack.c.bf16 %v256_v4, %v255_v2  ;;  %v258_v7 = vld [vmem:[#allocation5 + $0x28] sm:$0xff]  ;;  %v245_v9 = vld [vmem:[%s1287_s25] sm:$0xff]  ;;  %v259_v10 = vld [vmem:[#allocation5 + $0x30] sm:$0xff]  ;;  %s544_s27 = scalar_lea.sflag [#allocation4], %s1281_s8  ;;  %s995_s20 = scalar_lea.vmem %s1319_s12, 1024 }
  0x6c   : > { %791 = vmatprep.subr.bf16.mxu0 %v790_v3  ;;  %v798_v8 = vpack.c.bf16 %v258_v7, %v257_v6  ;;  %v260_v11 = vld [vmem:[#allocation5 + $0x38] sm:$0xff]  ;;  %750 = vmatprep.mubr.f32.mxu0 %v245_v9  ;;  %v261_v13 = vld [vmem:[#allocation5 + $0x40] sm:$0xff]  ;;  %v262_v14 = vld [vmem:[#allocation5 + $0x48] sm:$0xff]  ;;  %p996_p11 = scmp.ne.s32.totalorder %s1319_s12, %s995_s20  ;;  %p1386_p0 = scmp.ne.s32.totalorder %s1381_s13, 0 }
  0x6d   : > { %793 = vmatpush3.bf16.msra.mxu0 %v790_v3  ;;  %v802_v12 = vpack.c.bf16 %v260_v11, %v259_v10  ;;  %v806_v15 = vpack.c.bf16 %v262_v14, %v261_v13  ;;  %v263_v16 = vld [vmem:[#allocation5 + $0x50] sm:$0xff]  ;;  %v264_v17 = vld [vmem:[#allocation5 + $0x58] sm:$0xff]  ;;  %v265_v19 = vld [vmem:[#allocation5 + $0x60] sm:$0xff]  ;;  %s1072_s19 = smov [#allocation8]  }
  0x6e   : > { %795 = vmatprep.subr.bf16.mxu0 %v794_v5  ;;  %v810_v18 = vpack.c.bf16 %v264_v17, %v263_v16  ;;  %v266_v20 = vld [vmem:[#allocation5 + $0x68] sm:$0xff]  ;;  %v267_v22 = vld [vmem:[#allocation5 + $0x70] sm:$0xff]  ;;  %v268_v23 = vld [vmem:[#allocation5 + $0x78] sm:$0xff]  ;;  %p997_p2 = pnand %p996_p11, %p1386_p0  ;;  %s999_s29 = sshll.u32 %s1072_s19, 4  ;;  %s1000_s29 = int_to_ptr.vmem [resolvable:$false] %s999_s29 }
  0x6f   : > { %v814_v21 = vpack.c.bf16 %v266_v20, %v265_v19  ;;  %v818_v24 = vpack.c.bf16 %v268_v23, %v267_v22  ;;  %v246_v25 = vld [vmem:[%s1287_s25 + $0x8] sm:$0xff]  ;;  %v247_v26 = vld [vmem:[%s1287_s25 + $0x10] sm:$0xff]  ;;  %v248_v27 = vld [vmem:[%s1287_s25 + $0x18] sm:$0xff]  ;;  %s1001_s5 = scalar_lea.vmem %s1000_s29, 2048  ;;  %p1002_p7 = scmp.lt.s32.totalorder %s1319_s12, %s1000_s29 }
  0x70   : > { %v249_v28 = vld [vmem:[%s1287_s25 + $0x20] sm:$0xff]  ;;  %v250_v29 = vld [vmem:[%s1287_s25 + $0x28] sm:$0xff]  ;;  %v251_v30 = vld [vmem:[%s1287_s25 + $0x30] sm:$0xff]  ;;  %p998_p3 = pneg %p997_p2  ;;  %p1003_p9 = scmp.lt.s32.totalorder %s1001_s5, %s995_s20 }
  0x71   : > { %797 = vmatpush3.bf16.msra.mxu0 %v794_v5  ;;  %v252_v31 = vld [vmem:[%s1287_s25 + $0x38] sm:$0xff]  ;;  %v397_v32 = vld [vmem:[#allocation7] sm:$0xff]  ;;  %v398_v6 = vld [vmem:[#allocation7 + $0x8] sm:$0xff] }
  0x72   : > { %799 = vmatprep.subr.bf16.mxu0 %v798_v8  ;;  %778 = vmatprep.mubr.msk.f32.mxu1 %vm405_vm0, %v397_v32  ;;  %v662_v33 = vld [vmem:[%s1370_s2] ss:$0 sm:$0xff]  ;;  %v399_v7 = vld [vmem:[#allocation7 + $0x10] sm:$0xff]  ;;  %v402_v10 = vld [vmem:[#allocation7 + $0x28] sm:$0xff]  ;;  %p1004_p12 = por %p1003_p9, %p1002_p7 }
  0x73   : > { %v403_v11 = vld [vmem:[#allocation7 + $0x30] sm:$0xff] }
  0x74   : > { %p1005_p1 = pnand %p1004_p12, %p998_p3 }
  0x75   : > { %801 = vmatpush3.bf16.msra.mxu0 %v798_v8  ;;  %v400_v8 = vld [vmem:[#allocation7 + $0x18] sm:$0xff] }
  0x76   : > { %803 = vmatprep.subr.bf16.mxu0 %v802_v12 }
  0x79   : > { %805 = vmatpush3.bf16.msra.mxu0 %v802_v12  ;;  %v404_v12 = vld [vmem:[#allocation7 + $0x38] sm:$0xff] }
  0x7a   : > { %807 = vmatprep.subr.bf16.mxu0 %v806_v15 }
  0x7d   : > { %809 = vmatpush3.bf16.msra.mxu0 %v806_v15 }
  0x7e   : > { %811 = vmatprep.subr.bf16.mxu0 %v810_v18 }
  0x81   : > { %813 = vmatpush3.bf16.msra.mxu0 %v810_v18 }
  0x82   : > { %815 = vmatprep.subr.bf16.mxu0 %v814_v21 }
  0x85   : > { %817 = vmatpush3.bf16.msra.mxu0 %v814_v21 }
  0x86   : > { %819 = vmatprep.subr.bf16.mxu0 %v818_v24 }
  0x89   : > { %821 = vmatpush3.bf16.msra.mxu0 %v818_v24 }
  0x8c   : > { %751 = vmatmul.mubr.f32.vlgmr.msra.gmra.mrb[0].mxu0 %v246_v25 }
  0x8d   : > { %753 = vmatprep.mubr.f32.mxu0 %v247_v26 }
  0x90   : > { %754 = vmatmul.mubr.f32.gmra.mrb[2].mxu0 %v248_v27 }
  0x91   : > { %756 = vmatprep.mubr.f32.mxu0 %v249_v28 }
  0x94   : > { %757 = vmatmul.mubr.f32.gmra.mrb[4].mxu0 %v250_v29 }
  0x95   : > { %759 = vmatprep.mubr.f32.mxu0 %v251_v30 }
  0x98   : > { %760 = vmatmul.mubr.f32.gmra.mrb[6].mxu0 %v252_v31 }
 0x15f   : > { %v752_v34 = vpop.f32.mrb[0].mxu0 }
 0x160   : > { %v348_v35 = vadd.f32 %v752_v34, %v662_v33  ;;  %v342_v36 = vpop.f32.mrb[1].mxu0 }
 0x161   : > { %v343_v37 = vadd.f32 %v662_v33, %v342_v36 }
 0x162   : > { %v382_v38 = vadd.f32 %v348_v35, %v246_v25 }
 0x163   : > { %v381_v39 = vadd.f32 %v343_v37, %v245_v9  ;;  %v755_v40 = vpop.f32.mrb[2].mxu0  ;;  %v401_v9 = vld [vmem:[#allocation7 + $0x20] sm:$0xff] }
 0x164   : > { %v390_v41 = vmax.f32 %v382_v38, 0.0  ;;  %v358_v42 = vadd.f32 %v755_v40, %v662_v33  ;;  %v352_v43 = vpop.f32.mrb[3].mxu0 }
 0x165   : > { %v389_v44 = vmax.f32 %v381_v39, 0.0  ;;  %v353_v45 = vadd.f32 %v662_v33, %v352_v43 }
 0x166   : > { %v384_v46 = vadd.f32 %v358_v42, %v248_v27 }
 0x167   : > { %v383_v47 = vadd.f32 %v353_v45, %v247_v26  ;;  %v758_v48 = vpop.f32.mrb[4].mxu0  ;;  %v822_v49 = vpack.c.bf16 %v390_v41, %v389_v44 }
 0x168   : > { %v392_v50 = vmax.f32 %v384_v46, 0.0  ;;  %v368_v51 = vadd.f32 %v758_v48, %v662_v33  ;;  %v362_v52 = vpop.f32.mrb[5].mxu0 }
 0x169   : > { %v391_v53 = vmax.f32 %v383_v47, 0.0  ;;  %v363_v54 = vadd.f32 %v662_v33, %v362_v52  ;;  %823 = vmatprep.subr.bf16.mxu1 %v822_v49 }
 0x16a   : > { %v386_v55 = vadd.f32 %v368_v51, %v250_v29  ;;  %825 = vmatpush3.bf16.msra.mxu1 %v822_v49 }
 0x16b   : > { %v385_v56 = vadd.f32 %v363_v54, %v249_v28  ;;  %v761_v57 = vpop.f32.mrb[6].mxu0  ;;  %v826_v58 = vpack.c.bf16 %v392_v50, %v391_v53 }
 0x16c   : > { %v394_v59 = vmax.f32 %v386_v55, 0.0  ;;  %v378_v60 = vadd.f32 %v761_v57, %v662_v33  ;;  %v372_v61 = vpop.f32.mrb[7].mxu0 }
 0x16d   : > { %v393_v62 = vmax.f32 %v385_v56, 0.0  ;;  %v373_v63 = vadd.f32 %v662_v33, %v372_v61  ;;  %827 = vmatprep.subr.bf16.mxu1 %v826_v58 }
 0x16e   : > { %v388_v0 = vadd.f32 %v378_v60, %v252_v31  ;;  %829 = vmatpush3.bf16.msra.mxu1 %v826_v58 }
 0x16f   : > { %v387_v1 = vadd.f32 %v373_v63, %v251_v30  ;;  %v830_v2 = vpack.c.bf16 %v394_v59, %v393_v62 }
 0x170   : > { %v396_v3 = vmax.f32 %v388_v0, 0.0 }
 0x171   : > { %v395_v4 = vmax.f32 %v387_v1, 0.0  ;;  %831 = vmatprep.subr.bf16.mxu1 %v830_v2 }
 0x172   : > { %833 = vmatpush3.bf16.msra.mxu1 %v830_v2 }
 0x173   : > { %v834_v5 = vpack.c.bf16 %v396_v3, %v395_v4 }
 0x175   : > { %835 = vmatprep.subr.bf16.mxu1 %v834_v5 }
 0x176   : > { %837 = vmatpush3.bf16.msra.mxu1 %v834_v5 }
 0x179   : > { %779 = vmatmul.mubr.msk.f32.vlgmr.msra.gmra.mrb[0].mxu1 %vm405_vm0, %v398_v6 }
 0x17a   : > { %781 = vmatprep.mubr.msk.f32.mxu1 %vm405_vm0, %v399_v7 }
 0x17d   : > { %782 = vmatmul.mubr.msk.f32.gmra.mrb[2].mxu1 %vm405_vm0, %v400_v8 }
 0x17e   : > { %784 = vmatprep.mubr.msk.f32.mxu1 %vm405_vm0, %v401_v9 }
 0x181   : > { %785 = vmatmul.mubr.msk.f32.gmra.mrb[4].mxu1 %vm405_vm0, %v402_v10 }
 0x182   : > { %787 = vmatprep.mubr.msk.f32.mxu1 %vm405_vm0, %v403_v11 }
 0x185   : > { %788 = vmatmul.mubr.msk.f32.gmra.mrb[6].mxu1 %vm405_vm0, %v404_v12 }
 0x24c   : > { %v780_v13 = vpop.f32.mrb[0].mxu1 }
 0x24d   : > { %536 = vst [vmem:[%s244_s11 + $0x8] sm:$0xff] %v780_v13  ;;  %v496_v14 = vpop.f32.mrb[1].mxu1 }
 0x24e   : > { %535 = vst [vmem:[%s244_s11] sm:$0xff] %v496_v14 }
 0x250   : > { %v783_v15 = vpop.f32.mrb[2].mxu1 }
 0x251   : > { %538 = vst [vmem:[%s244_s11 + $0x18] sm:$0xff] %v783_v15  ;;  %v506_v16 = vpop.f32.mrb[3].mxu1 }
 0x252   : > { %537 = vst [vmem:[%s244_s11 + $0x10] sm:$0xff] %v506_v16 }
 0x254   : > { %v786_v17 = vpop.f32.mrb[4].mxu1 }
 0x255   : > { %540 = vst [vmem:[%s244_s11 + $0x28] sm:$0xff] %v786_v17  ;;  %v516_v18 = vpop.f32.mrb[5].mxu1 }
 0x256   : > { %539 = vst [vmem:[%s244_s11 + $0x20] sm:$0xff] %v516_v18 }
 0x258   : > { %v789_v19 = vpop.f32.mrb[6].mxu1 }
 0x259   : > { %542 = vst [vmem:[%s244_s11 + $0x38] sm:$0xff] %v789_v19  ;;  %v526_v20 = vpop.f32.mrb[7].mxu1 }
 0x25a   : > { %541 = vst [vmem:[%s244_s11 + $0x30] sm:$0xff] %v526_v20 }
 0x25b   : > { %1008 = shalt.err (!%p1005_p1)
}
 0x25c   : > { %s1009_s9 = scalar_lea.hbm %s1324_s28, 1024  ;;  %s1013_s25 = scalar_lea.hbm %s1372_s4, 2048 }
 0x25d   : > { %p1010_p13 = scmp.ne.s32.totalorder %s1324_s28, %s1009_s9  ;;  %p1014_p4 = scmp.lt.u32.totalorder %s1324_s28, %s1372_s4 }
 0x25e   : > { %p1015_p5 = scmp.lt.u32.totalorder %s1013_s25, %s1009_s9  ;;  %p1017_p11 = scmp.lt.u32.totalorder %s1009_s9, %s1324_s28 }
 0x25f   : > { %p1011_p6 = pnand %p1010_p13, %p1386_p0 }
 0x260   : > { %p1016_p8 = por %p1015_p5, %p1014_p4 }
 0x261   : > { %p1012_p10 = pneg %p1011_p6 }
 0x262   : > { %p1018_p2 = por %p1017_p11, %p1016_p8 }
 0x264   : > { %p1019_p3 = pnand %p1018_p2, %p1012_p10 }
 0x266   : > { %1022 = shalt.err (!%p1019_p3)
}
 0x267   : > { %s1073_s11 = smov 128   ;;  %s1074_s30 = smov 8  }
 0x268   : > { %848 = dma.vmem_to_hbm [thread:$0]  (%p1386_p0), %s1319_s12, 1024, %s1324_s28, %s544_s27, %s1073_s11, %s1073_s11, %s1074_s30  }
 0x269 PF: > { %s572_s6 = sand.u32 1, %s1053_s15   ;;  %p1387_p7 = scmp.ne.s32.totalorder %s1377_s22, 0 }
 0x26a   : > { %p1388_p9 = scmp.ge.s32.totalorder %s1065_s18, 2  ;;  %s573_s7 = scalar_lea.sflag [#allocation4], %s572_s6 }
 0x26c   : > { %p862_p12 = pnand %p1388_p9, %p1387_p7 }
 0x26e   : > { %1048 = dma.done.wait (!%p862_p12), %s573_s7, 1024  }
 0x26f   : > { %1050 = vsyncadd (!%p862_p12), %s573_s7, 4294966272  ;;  %p18_p1 = scmp.ge.s32.totalorder %s1216_s26, 4   ;;  %s1389_s15 = smov %s1057_s16 }
 0x270   : > { %s1390_s16 = smov %s1061_s17  ;;  %s1391_s17 = smov %s1232_s14 }
 0x271   : > { %s1392_s18 = smov %s1216_s26  ;;  %20 = sbr.rel (!%p18_p1) target bundleno = 6 (0x6), region = 89 }
 0x278   :  { %578 = vsyncpa [#allocation3], 1 }
 0x279   :  { %580 = vsyncpa [#allocation3 + $0x1], 1 }
 0x27a   :  { %581 = vsyncpa [#allocation6], 1 }
 0x27b   :  { %582 = vsyncpa [#allocation4], 1 }
 0x27c   :  { %584 = vsyncpa [#allocation4 + $0x1], 1 }

</bundles_post_ra>
